<compile_context>
chip_gen: v7x
topology: tpu7x:2x2x1
jax: 0.10.0
libtpu: 0.0.40
codegen_flags: <defaults>
</compile_context>

<pallas_src>
import functools

import jax
import jax.numpy as jnp
import numpy as np
from jax import lax
from jax.experimental import pallas as pl
from jax.experimental.pallas import tpu as pltpu


def _round_up(v, m):
    return ((v + m - 1) // m) * m


def _fused_ce_kernel(x_ref, w_ref, b_ref, t_ref, loss_ref, logits_ref,
                     *, num_heads, n_classes):
    """One grid step = one token tile, all heads fused.

    x_ref:      (TN, H)          bf16 token tile
    w_ref:      (H, heads*C)     bf16 fused weights (resident across tiles)
    b_ref:      (1, heads*C)     f32 fused bias     (resident across tiles)
    t_ref:      (TN, heads)      int32 targets for this tile
    loss_ref:   (TN, 1)          f32 per-token CE summed over heads
    logits_ref: (TN, heads*C)    fused logits (pred_targets output)
    """
    C = n_classes

    x = x_ref[...]                                    # (TN, H) bf16
    w = w_ref[...]                                    # (H, heads*C) bf16
    b = b_ref[...]                                    # (1, heads*C) f32

    # Single MXU pass for all heads, f32 accumulation.
    logits = jnp.dot(x, w, preferred_element_type=jnp.float32) + b
    logits_ref[...] = logits.astype(logits_ref.dtype)

    t = t_ref[...]                                    # (TN, heads) int32

    # Per-head numerically-stable cross entropy on C-wide static slices,
    # summed across heads (static Python loop: num_heads is small & static).
    ce_sum = None
    for h in range(num_heads):
        lg = logits[:, h * C:(h + 1) * C]                             # (TN, C)
        m = jnp.max(lg, axis=-1, keepdims=True)                       # (TN, 1)
        lse = m + jnp.log(jnp.sum(jnp.exp(lg - m), axis=-1,
                                  keepdims=True))                     # (TN, 1)
        tgt = t[:, h:h + 1]                                           # (TN, 1)
        cols = lax.broadcasted_iota(jnp.int32, lg.shape, 1)           # (TN, C)
        tgt_logit = jnp.sum(jnp.where(cols == tgt, lg, 0.0),
                            axis=-1, keepdims=True)                   # (TN, 1)
        ce = lse - tgt_logit
        ce_sum = ce if ce_sum is None else ce_sum + ce

    loss_ref[...] = ce_sum


def _vmem_budget_bytes(tn, h, hc, heads):
    """Explicit VMEM budget for the chosen tiles ((8,128) padding included)."""
    def padded(rows, cols, itemsize):
        return _round_up(rows, 8) * _round_up(cols, 128) * itemsize

    x_t = padded(tn, h, 2)          # bf16 token tile
    t_t = padded(tn, heads, 4)      # int32 targets (lane-padded)
    lg_t = padded(tn, hc, 4)        # f32 logits tile
    ls_t = padded(tn, 1, 4)         # f32 loss tile (lane-sparse but tiny)
    w_r = padded(h, hc, 2)          # resident fused weights
    b_r = padded(1, hc, 4)          # resident fused bias

    total = 2 * (x_t + t_t + lg_t + ls_t) + 2 * (w_r + b_r)
    total += 2 * 1024 * 1024        # headroom for compiler scratch
    # Clamp at v7x's 64 MiB physical VMEM per TensorCore.
    return min(total, 64 * 1024 * 1024)


def multihead_ce(x, weights, biases, targets, *, tn=None,
                 logits_dtype=jnp.float32):
    """x: (N, H) f32; weights: (heads, H, C); biases: (heads, C);
    targets: (heads, N) int.
    Returns (loss_per_token (N,) f32, logits (heads, N, C) logits_dtype)."""
    num_heads, H, C = weights.shape
    N = x.shape[0]
    HC = num_heads * C

    # Token tile: 512 is the measured HBM-roofline sweet spot; shrink for tiny N.
    if tn is None:
        tn = 512 if N >= 512 else max(8, _round_up(N, 8))
    n_pad = _round_up(N, tn)
    num_tiles = n_pad // tn

    # Pad tokens to a tile multiple; padded rows are dropped in the wrapper.
    x_p = jnp.zeros((n_pad, H), jnp.bfloat16).at[:N].set(
        x.astype(jnp.bfloat16))
    t_p = jnp.zeros((n_pad, num_heads), jnp.int32).at[:N].set(
        jnp.asarray(targets, jnp.int32).T)

    # Fused layout: column block h*C:(h+1)*C of W_all holds head h.
    w_all = jnp.transpose(weights, (1, 0, 2)).reshape(H, HC).astype(
        jnp.bfloat16)
    b_all = jnp.asarray(biases, jnp.float32).reshape(1, HC)

    kernel = functools.partial(_fused_ce_kernel,
                               num_heads=num_heads, n_classes=C)

    grid_spec = pltpu.PrefetchScalarGridSpec(
        num_scalar_prefetch=0,
        grid=(num_tiles,),
        in_specs=[
            pl.BlockSpec((tn, H), lambda i: (i, 0)),          # token tile
            pl.BlockSpec((H, HC), lambda i: (0, 0)),          # resident weights
            pl.BlockSpec((1, HC), lambda i: (0, 0)),          # resident bias
            pl.BlockSpec((tn, num_heads), lambda i: (i, 0)),  # targets tile
        ],
        out_specs=[
            pl.BlockSpec((tn, 1), lambda i: (i, 0)),          # loss tile
            pl.BlockSpec((tn, HC), lambda i: (i, 0)),         # logits tile
        ],
    )

    out_shape = (
        jax.ShapeDtypeStruct((n_pad, 1), jnp.float32),
        jax.ShapeDtypeStruct((n_pad, HC), logits_dtype),
    )

    loss_p, logits_p = pl.pallas_call(
        kernel,
        grid_spec=grid_spec,
        out_shape=out_shape,
        compiler_params=pltpu.CompilerParams(
            # Token axis is independent (no cross-step accumulation):
            # safe to shard across v7x's two TensorCores, neutral on v5e/v6e.
            dimension_semantics=("parallel",),
            vmem_limit_bytes=_vmem_budget_bytes(tn, H, HC, num_heads),
        ),
    )(x_p, w_all, b_all, t_p)

    loss_tok = loss_p[:N, 0]                                         # (N,)
    logits = logits_p[:N].reshape(N, num_heads, C).transpose(1, 0, 2)
    return loss_tok, logits


def compute_loss_cp2k_forward(inputs, targets, masks, weights, biases):
    """Mirrors compute_loss_cp2k.forward.

    inputs:  (batch, seq, H) f32
    targets: (heads, batch, seq) int32
    masks:   (seq, batch) bool   -- True = masked out (PyTorch: pred[~masks.T])
    Returns (loss_on_valid_positions (n_valid,), pred_targets list of
    (batch, seq, C))."""
    num_heads = targets.shape[0]
    batch, seq, H = inputs.shape
    C = weights.shape[-1]
    N = batch * seq

    x = inputs.reshape(N, H).astype(jnp.float32)
    t = targets.reshape(num_heads, N)

    loss_tok, logits = multihead_ce(x, weights, biases, t)

    # TODO(synk): dynamic-shape boolean selection (pred[~masks.T]) has no
    # Pallas equivalent (variable-length output); done as host-side glue.
    valid = np.asarray(~masks.T).reshape(-1)                         # (N,) bool
    loss = loss_tok[valid]

    pred_targets = [logits[i].reshape(batch, seq, C)
                    for i in range(num_heads)]
    return loss, pred_targets


if __name__ == "__main__":
    # Small deterministic shapes.
    batch, seq, H, C, num_heads = 2, 8, 32, 16, 2
    N = batch * seq

    key = jax.random.PRNGKey(0)
    k_x, k_w, k_b, k_t, k_m = jax.random.split(key, 5)

    inputs = jax.random.normal(k_x, (batch, seq, H), dtype=jnp.float32)
    weights = (jax.random.normal(k_w, (num_heads, H, C), dtype=jnp.float32)
               / jnp.sqrt(H))
    biases = 0.1 * jax.random.normal(k_b, (num_heads, C), dtype=jnp.float32)
    targets = jax.random.randint(k_t, (num_heads, batch, seq), 0, C,
                                 dtype=jnp.int32)
    masks = jax.random.bernoulli(k_m, 0.25, (seq, batch))            # bool

    loss, pred_targets = compute_loss_cp2k_forward(
        inputs, targets, masks, weights, biases)
    jax.block_until_ready(loss)
    jax.block_until_ready(pred_targets)

    # Pure-JAX reference (same bf16-input / f32-accumulation matmul contract).
    x = inputs.reshape(N, H)
    xb = x.astype(jnp.bfloat16)
    ref_tok = jnp.zeros((N,), jnp.float32)
    ref_preds = []
    for i in range(num_heads):
        logits = jnp.dot(xb, weights[i].astype(jnp.bfloat16),
                         preferred_element_type=jnp.float32) + biases[i]
        logp = jax.nn.log_softmax(logits, axis=-1)
        t_i = targets[i].reshape(N)
        ref_tok = ref_tok + (-jnp.take_along_axis(
            logp, t_i[:, None], axis=-1)[:, 0])
        ref_preds.append(logits.reshape(batch, seq, C))
    valid = np.asarray(~masks.T).reshape(-1)
    ref_loss = ref_tok[valid]

    assert np.allclose(np.asarray(loss), np.asarray(ref_loss),
                       rtol=1e-4, atol=1e-4)
    for i in range(num_heads):
        assert np.allclose(np.asarray(pred_targets[i]),
                           np.asarray(ref_preds[i]), rtol=1e-4, atol=1e-4)

    print("KERNEL_OK")
</pallas_src>

<mosaic_0001>
module attributes {stable_mosaic.version = 11 : i64} {
  func.func @_fused_ce_kernel(%arg0: i32, %arg1: memref<16x32xbf16, #tpu.memory_space<vmem>>, %arg2: memref<32x32xbf16, #tpu.memory_space<vmem>>, %arg3: memref<1x32xf32, #tpu.memory_space<vmem>>, %arg4: memref<16x2xi32, #tpu.memory_space<vmem>>, %arg5: memref<16x1xf32, #tpu.memory_space<vmem>>, %arg6: memref<16x32xf32, #tpu.memory_space<vmem>>) attributes {dimension_semantics = [#tpu.dimension_semantics<parallel>], iteration_bounds = array<i64: 1>, scalar_prefetch = 0 : i64, scratch_operands = 0 : i64, tpu.core_type = #tpu.core_type<tc>, window_params = [{transform_indices = @transform_0, window_bounds = array<i64: 16, 32>}, {pipeline_mode = #tpu.pipeline_mode<synchronous>, transform_indices = @transform_1, window_bounds = array<i64: 32, 32>}, {pipeline_mode = #tpu.pipeline_mode<synchronous>, transform_indices = @transform_2, window_bounds = array<i64: 1, 32>}, {transform_indices = @transform_3, window_bounds = array<i64: 16, 2>}, {transform_indices = @transform_4, window_bounds = array<i64: 16, 1>}, {transform_indices = @transform_5, window_bounds = array<i64: 16, 32>}]} {
    %c0 = arith.constant 0 : index
    %c0_0 = arith.constant 0 : index
    %0 = vector.load %arg1[%c0, %c0_0] : memref<16x32xbf16, #tpu.memory_space<vmem>>, vector<16x32xbf16>
    %c0_1 = arith.constant 0 : index
    %c0_2 = arith.constant 0 : index
    %1 = vector.load %arg2[%c0_1, %c0_2] : memref<32x32xbf16, #tpu.memory_space<vmem>>, vector<32x32xbf16>
    %c0_3 = arith.constant 0 : index
    %c0_4 = arith.constant 0 : index
    %2 = vector.load %arg3[%c0_3, %c0_4] : memref<1x32xf32, #tpu.memory_space<vmem>>, vector<1x32xf32>
    %cst = arith.constant dense<0.000000e+00> : vector<16x32xf32>
    %3 = tpu.matmul %0, %1, %cst {dimension_numbers = #tpu.dot_dimension_numbers<[1], [0], [0], [1], [0, 0, 1, 1], [], []>} : vector<16x32xbf16>, vector<32x32xbf16>, vector<16x32xf32> -> vector<16x32xf32>
    %4 = vector.broadcast %2 : vector<1x32xf32> to vector<16x32xf32>
    %5 = arith.addf %3, %4 : vector<16x32xf32>
    %c0_5 = arith.constant 0 : index
    %c0_6 = arith.constant 0 : index
    %6 = vector.load %arg6[%c0_5, %c0_6] : memref<16x32xf32, #tpu.memory_space<vmem>>, vector<16x32xf32>
    tpu.vector_store %arg6[%c0_5, %c0_6], %5 {strides = array<i32>} : memref<16x32xf32, #tpu.memory_space<vmem>>, vector<16x32xf32>,
    %c0_7 = arith.constant 0 : index
    %c0_8 = arith.constant 0 : index
    %7 = vector.load %arg4[%c0_7, %c0_8] : memref<16x2xi32, #tpu.memory_space<vmem>>, vector<16x2xi32>
    %8 = vector.extract_strided_slice %5 {offsets = [0, 0], sizes = [16, 16], strides = [1, 1]} : vector<16x32xf32> to vector<16x16xf32>
    %cst_9 = arith.constant dense<0xFF800000> : vector<16xf32>
    %9 = vector.multi_reduction <maximumf>, %8, %cst_9 [1] : vector<16x16xf32> to vector<16xf32>
    %10 = vector.shape_cast %9 : vector<16xf32> to vector<16x1xf32>
    %11 = vector.broadcast %10 : vector<16x1xf32> to vector<16x16xf32>
    %12 = arith.subf %8, %11 : vector<16x16xf32>
    %13 = math.exp %12 : vector<16x16xf32>
    %cst_10 = arith.constant dense<0.000000e+00> : vector<16xf32>
    %14 = vector.multi_reduction <add>, %13, %cst_10 [1] : vector<16x16xf32> to vector<16xf32>
    %15 = vector.shape_cast %14 : vector<16xf32> to vector<16x1xf32>
    %16 = math.log %15 : vector<16x1xf32>
    %17 = arith.addf %10, %16 : vector<16x1xf32>
    %18 = vector.extract_strided_slice %7 {offsets = [0, 0], sizes = [16, 1], strides = [1, 1]} : vector<16x2xi32> to vector<16x1xi32>
    %19 = tpu.iota {dimensions = array<i32: 1>} : vector<16x16xi32>
    %20 = vector.broadcast %18 : vector<16x1xi32> to vector<16x16xi32>
    %21 = arith.cmpi eq, %19, %20 : vector<16x16xi32>
    %cst_11 = arith.constant 0.000000e+00 : f32
    %22 = vector.broadcast %cst_11 : f32 to vector<16x16xf32>
    %23 = arith.select %21, %8, %22 : vector<16x16xi1>, vector<16x16xf32>
    %cst_12 = arith.constant dense<0.000000e+00> : vector<16xf32>
    %24 = vector.multi_reduction <add>, %23, %cst_12 [1] : vector<16x16xf32> to vector<16xf32>
    %25 = vector.shape_cast %24 : vector<16xf32> to vector<16x1xf32>
    %26 = arith.subf %17, %25 : vector<16x1xf32>
    %27 = vector.extract_strided_slice %5 {offsets = [0, 16], sizes = [16, 16], strides = [1, 1]} : vector<16x32xf32> to vector<16x16xf32>
    %cst_13 = arith.constant dense<0xFF800000> : vector<16xf32>
    %28 = vector.multi_reduction <maximumf>, %27, %cst_13 [1] : vector<16x16xf32> to vector<16xf32>
    %29 = vector.shape_cast %28 : vector<16xf32> to vector<16x1xf32>
    %30 = vector.broadcast %29 : vector<16x1xf32> to vector<16x16xf32>
    %31 = arith.subf %27, %30 : vector<16x16xf32>
    %32 = math.exp %31 : vector<16x16xf32>
    %cst_14 = arith.constant dense<0.000000e+00> : vector<16xf32>
    %33 = vector.multi_reduction <add>, %32, %cst_14 [1] : vector<16x16xf32> to vector<16xf32>
    %34 = vector.shape_cast %33 : vector<16xf32> to vector<16x1xf32>
    %35 = math.log %34 : vector<16x1xf32>
    %36 = arith.addf %29, %35 : vector<16x1xf32>
    %37 = vector.extract_strided_slice %7 {offsets = [0, 1], sizes = [16, 1], strides = [1, 1]} : vector<16x2xi32> to vector<16x1xi32>
    %38 = tpu.iota {dimensions = array<i32: 1>} : vector<16x16xi32>
    %39 = vector.broadcast %37 : vector<16x1xi32> to vector<16x16xi32>
    %40 = arith.cmpi eq, %38, %39 : vector<16x16xi32>
    %cst_15 = arith.constant 0.000000e+00 : f32
    %41 = vector.broadcast %cst_15 : f32 to vector<16x16xf32>
    %42 = arith.select %40, %27, %41 : vector<16x16xi1>, vector<16x16xf32>
    %cst_16 = arith.constant dense<0.000000e+00> : vector<16xf32>
    %43 = vector.multi_reduction <add>, %42, %cst_16 [1] : vector<16x16xf32> to vector<16xf32>
    %44 = vector.shape_cast %43 : vector<16xf32> to vector<16x1xf32>
    %45 = arith.subf %36, %44 : vector<16x1xf32>
    %46 = arith.addf %26, %45 : vector<16x1xf32>
    %c0_17 = arith.constant 0 : index
    %c0_18 = arith.constant 0 : index
    %47 = vector.load %arg5[%c0_17, %c0_18] : memref<16x1xf32, #tpu.memory_space<vmem>>, vector<16x1xf32>
    tpu.vector_store %arg5[%c0_17, %c0_18], %46 {strides = array<i32>} : memref<16x1xf32, #tpu.memory_space<vmem>>, vector<16x1xf32>,
    return
  }
  func.func @transform_0(%arg0: i32) -> (i32, i32) {
    %c0_i32 = arith.constant 0 : i32
    %c0_i32_0 = arith.constant 0 : i32
    return %arg0, %c0_i32 : i32, i32
  }
  func.func @transform_1(%arg0: i32) -> (i32, i32) {
    %c0_i32 = arith.constant 0 : i32
    %c0_i32_0 = arith.constant 0 : i32
    %c0_i32_1 = arith.constant 0 : i32
    return %c0_i32, %c0_i32_0 : i32, i32
  }
  func.func @transform_2(%arg0: i32) -> (i32, i32) {
    %c0_i32 = arith.constant 0 : i32
    %c0_i32_0 = arith.constant 0 : i32
    %c0_i32_1 = arith.constant 0 : i32
    return %c0_i32, %c0_i32_0 : i32, i32
  }
  func.func @transform_3(%arg0: i32) -> (i32, i32) {
    %c0_i32 = arith.constant 0 : i32
    %c0_i32_0 = arith.constant 0 : i32
    return %arg0, %c0_i32 : i32, i32
  }
  func.func @transform_4(%arg0: i32) -> (i32, i32) {
    %c0_i32 = arith.constant 0 : i32
    %c0_i32_0 = arith.constant 0 : i32
    return %arg0, %c0_i32 : i32, i32
  }
  func.func @transform_5(%arg0: i32) -> (i32, i32) {
    %c0_i32 = arith.constant 0 : i32
    %c0_i32_0 = arith.constant 0 : i32
    return %arg0, %c0_i32 : i32, i32
  }
}

</mosaic_0001>

<bundles_post_ra>
// kernel: tpu_custom_call.1
= control target key start
LH: loop header
LB: loop body
LE: loop exit
PB: predicated region body
PF: predicated region fallthrough
CT: control target
= control target key end

     0   :  { %11 = vsyncpa [#allocation3], 0  ;;  %s465_s0 = inlined_call_operand.hbm [shape: bf16[16,32], index: 0, kind: input, shape index: {}]   ;;  %s466_s1 = inlined_call_operand.vmem [shape: bf16[32,32], index: 1, kind: input, shape index: {}]   ;;  %s467_s2 = inlined_call_operand.vmem [shape: f32[1,32], index: 2, kind: input, shape index: {}]   ;;  %s468_s3 = inlined_call_operand.vmem [shape: s32[16,2], index: 3, kind: input, shape index: {}]   ;;  %s469_s4 = inlined_call_operand.vmem [shape: f32[16,1], index: 4, kind: output, shape index: {0}]   ;;  %s470_s5 = inlined_call_operand.hbm [shape: f32[16,32], index: 5, kind: output, shape index: {1}]  }
   0x1   :  { %12 = vsyncpa [#allocation4], 0  ;;  %s341_s18 = smov [#allocation2]   ;;  %s293_s22 = scalar_lea.hbm %s465_s0, 128 }
   0x2   :  { %s18_s19 = sshll.u32 %s341_s18, 4  ;;  %p294_p0 = scmp.ne.s32.totalorder %s465_s0, %s293_s22  ;;  %s19_s19 = int_to_ptr.vmem [resolvable:$true] %s18_s19 }
   0x3   :  { %p297_p1 = scmp.lt.u32.totalorder %s293_s22, %s465_s0 }
   0x5   :  { %p299_p2 = pnand %p297_p1, %p294_p0 }
   0x7   :  { %302 = shalt.err (!%p299_p2)
}
   0x8   :  { %s303_s27 = scalar_lea.vmem %s19_s19, 128  ;;  %p308_p4 = scmp.lt.s32.totalorder %s19_s19, %s19_s19 }
   0x9   :  { %p304_p3 = scmp.ne.s32.totalorder %s19_s19, %s303_s27  ;;  %p309_p5 = scmp.lt.s32.totalorder %s303_s27, %s303_s27 }
   0xb   :  { %p310_p6 = por %p309_p5, %p308_p4 }
   0xd   :  { %p311_p7 = pnand %p310_p6, %p304_p3 }
   0xf   :  { %314 = shalt.err (!%p311_p7)
}
  0x10   :  { %s342_s28 = smov 64   ;;  %s343_s29 = smov 4  }
  0x11   :  { %24 = dma.hbm_to_vmem [thread:$0]  %s465_s0, 128, %s19_s19, [#allocation3], %s342_s28, %s342_s28, %s343_s29  }
  0x12   :  { %337 = dma.done.wait [#allocation3], 128  }
  0x13   :  { %338 = vsyncadd [#allocation3], 4294967168  ;;  %v344_v0 = vmov 0.0   ;;  %vm345_vm0 = vmmov 0   ;;  %v274_v1 = vld [vmem:[%s466_s1] sm:$0xff]   ;;  %v275_v2 = vld [vmem:[%s466_s1 + $0x8] sm:$0xff]   ;;  %v139_v35 = vlaneseq }
  0x14   :  { %252 = vmatprep.subr.bf16.mxu0 %v344_v0  ;;  %256 = vmatprep.mubr.msk.bf16.mxu0 %vm345_vm0, %v344_v0  ;;  %v276_v3 = vld [vmem:[#allocation2] sm:$0xff]   ;;  %vm65_vm1 = vcmask 261120   ;;  %v346_v4 = vmov 0   ;;  %vm159_vm2 = vcmask 261248   ;;  %vm114_vm3 = vcmask 130048   ;;  %s348_s12 = smov 112  }
  0x15   :  { %253 = vmatpush3.bf16.msra.mxu0 %v274_v1  ;;  %271 = vset.pattern.permute.xlu1 %v346_v4  ;;  %v244_v5 = vld [vmem:[%s467_s2] ss:$0 sm:$0xff]  ;;  %v347_v17 = vmov 1   ;;  %v113_v26 = vld [vmem:[%s468_s3 + $0x8] sm:$0xff]  ;;  %v140_v36 = vand.u32 127, %v139_v35 }
  0x16   :  { %254 = vmatprep.subr.bf16.mxu0 %v344_v0  ;;  %v112_v16 = vld [vmem:[%s468_s3] sm:$0xff]  ;;  %272 = vset.pattern.permute.xlu0 %v347_v17  ;;  %s349_s3 = smov [#allocation5]  }
  0x17   :  { %s230_s15 = sshll.u32 %s349_s3, 4  ;;  %s231_s15 = int_to_ptr.vmem [resolvable:$true] %s230_s15 }
  0x18   :  { %s315_s16 = scalar_lea.vmem %s231_s15, 256  ;;  %p320_p9 = scmp.lt.s32.totalorder %s231_s15, %s231_s15 }
  0x19   :  { %255 = vmatpush3.bf16.msra.mxu0 %v275_v2  ;;  %p316_p8 = scmp.ne.s32.totalorder %s231_s15, %s315_s16  ;;  %p321_p10 = scmp.lt.s32.totalorder %s315_s16, %s315_s16 }
  0x1b   :  { %p322_p11 = por %p321_p10, %p320_p9 }
  0x1c   :  { %257 = vmatmul.mubr.msk.bf16.vlgmr.msra.gmra.mrb[0].mxu0 %vm65_vm1, %v276_v3 }
  0x1d   :  { %p323_p12 = pnand %p322_p11, %p316_p8 }
  0xef   :  { %v103_v6 = vpop.f32.mrb[0].mxu0 }
  0xf0   :  { %v104_v7 = vadd.f32 %v244_v5, %v103_v6  ;;  %v258_v8 = vpop.f32.mrb[1].mxu0 }
  0xf1   :  { %v106_v9 = vpop.f32.mrb[2].mxu0 }
  0xf2   :  { %110 = vst.msk [vmem:[#allocation5] sm:$0xff] %vm65_vm1, %v104_v7  ;;  %v405_v10 = vadd.f32 %v244_v5, %v106_v9  ;;  %v259_v11 = vpop.f32.mrb[3].mxu0  ;;  %v160_v12 = vsel %vm159_vm2, %v104_v7, -inf  ;;  %v115_v13 = vsel %vm114_vm3, %v104_v7, -inf }
  0xf3   :  { %161 = vmax.xlane.f32.xlu0 %v160_v12  ;;  %116 = vmax.xlane.f32.xlu1 %v115_v13 }
  0xf4   :  { %111 = vst.msk [vmem:[#allocation5 + $0x8] sm:$0xff] %vm65_vm1, %v405_v10  ;;  %v163_v14 = vsel %vm159_vm2, %v405_v10, -inf  ;;  %v118_v15 = vsel %vm114_vm3, %v405_v10, -inf }
  0xf7   :  { %164 = vmax.xlane.f32.xlu0 %v163_v14  ;;  %119 = vmax.xlane.f32.xlu1 %v118_v15 }
 0x108   :  { %142 = vperm.xlu1 %271, %v112_v16  }
 0x180   :  { %v416_v18 = vpop.xlane.xlu0 %161  ;;  %v426_v27 = vpop.xlane.xlu1 %116 }
 0x181   :  { %v166_v19 = vsub.f32 %v104_v7, %v416_v18  ;;  %v121_v31 = vsub.f32 %v104_v7, %v426_v27 }
 0x183   :  { %v168_v20 = vmul.f32 1.442695, %v166_v19  ;;  %v123_v33 = vmul.f32 1.442695, %v121_v31 }
 0x184   :  { %v419_v21 = vpop.xlane.xlu0 %164  ;;  %v429_v28 = vpop.xlane.xlu1 %119 }
 0x185   :  { %277 = vpow2.f32 %v168_v20  ;;  %v167_v22 = vsub.f32 %v405_v10, %v419_v21  ;;  %v122_v29 = vsub.f32 %v405_v10, %v429_v28 }
 0x187   :  { %v170_v23 = vmul.f32 1.442695, %v167_v22  ;;  %v125_v30 = vmul.f32 1.442695, %v122_v29 }
 0x188   :  { %v143_v37 = vpop.permute.xlu1 %142 }
 0x189   :  { %279 = vpow2.f32 %v170_v23  ;;  %vm147_vm4 = vcmp.eq.s32.totalorder %v140_v36, %v143_v37 }
 0x18a   :  { %281 = vpow2.f32 %v125_v30  ;;  %v149_v40 = vsel %vm147_vm4, %v104_v7, 0.0 }
 0x18b   :  { %283 = vpow2.f32 %v123_v33  ;;  %v151_v41 = vsel %vm114_vm3, %v149_v40, 0.0 }
 0x18f   :  { %v278_v24 = vpop.eup %277 }
 0x190   :  { %174 = vrot.lane.b32.xlu0 %v278_v24, %s348_s12 }
 0x193   :  { %v280_v25 = vpop.eup %279 }
 0x194   :  { %193 = vperm.xlu0 %272, %v112_v16   ;;  %176 = vrot.lane.b32.xlu1 %v280_v25, %s348_s12  ;;  %v282_v32 = vpop.eup %281 }
 0x195   :  { %v130_v34 = vsel %vm114_vm3, %v282_v32, 0.0  ;;  %v284_v38 = vpop.eup %283 }
 0x196   :  { %v127_v39 = vsel %vm114_vm3, %v284_v38, 0.0 }
 0x198   :  { %204 = vrot.lane.b32.xlu0 %v405_v10, %s348_s12  ;;  %145 = vperm.xlu1 %271, %v113_v26  }
 0x19c   :  { %273 = vset.pattern.permute.xlu1 %v347_v17 }
 0x19d   :  { %196 = vperm.xlu1 %273, %v113_v26  }
 0x1a1   :  { %202 = vrot.lane.b32.xlu1 %v104_v7, %s348_s12 }
 0x1b7   :  { %131 = vadd.xlane.f32.xlu0 %v130_v34 }
 0x1c5   :  { %128 = vadd.xlane.f32.xlu1 %v127_v39 }
 0x1c9   :  { %152 = vadd.xlane.f32.xlu1 %v151_v41 }
 0x202   :  { %v175_v42 = vpop.permute.xlu0 %174 }
 0x203   :  { %v180_v43 = vsel %vm114_vm3, %v175_v42, 0.0 }
 0x204   :  { %181 = vadd.xlane.f32.xlu0 %v180_v43 }
 0x206   :  { %v177_v44 = vpop.permute.xlu1 %176 }
 0x207   :  { %v183_v45 = vsel %vm114_vm3, %v177_v44, 0.0 }
 0x208   :  { %184 = vadd.xlane.f32.xlu0 %v183_v45 }
 0x213   :  { %v194_v46 = vpop.permute.xlu0 %193 }
 0x214   :  { %vm198_vm7 = vcmp.eq.s32.totalorder %v140_v36, %v194_v46 }
 0x217   :  { %v146_v47 = vpop.permute.xlu1 %145  ;;  %v205_v51 = vpop.permute.xlu0 %204 }
 0x218   :  { %vm148_vm5 = vcmp.eq.s32.totalorder %v140_v36, %v146_v47 }
 0x219   :  { %v150_v48 = vsel %vm148_vm5, %v405_v10, 0.0 }
 0x21a   :  { %v154_v49 = vsel %vm114_vm3, %v150_v48, 0.0 }
 0x21b   :  { %155 = vadd.xlane.f32.xlu0 %v154_v49 }
 0x21c   :  { %v197_v50 = vpop.permute.xlu1 %196 }
 0x21d   :  { %vm199_vm6 = vcmp.eq.s32.totalorder %v140_v36, %v197_v50 }
 0x21e   :  { %v209_v52 = vsel %vm199_vm6, %v205_v51, 0.0 }
 0x21f   :  { %v213_v53 = vsel %vm114_vm3, %v209_v52, 0.0 }
 0x220   :  { %214 = vadd.xlane.f32.xlu0 %v213_v53  ;;  %v203_v54 = vpop.permute.xlu1 %202 }
 0x221   :  { %v208_v55 = vsel %vm198_vm7, %v203_v54, 0.0 }
 0x222   :  { %v210_v56 = vsel %vm114_vm3, %v208_v55, 0.0 }
 0x223   :  { %211 = vadd.xlane.f32.xlu1 %v210_v56 }
 0x224   :  { %326 = shalt.err (!%p323_p12)
}
 0x225   :  { %s327_s19 = scalar_lea.hbm %s470_s5, 256 }
 0x226   :  { %p328_p13 = scmp.ne.s32.totalorder %s470_s5, %s327_s19  ;;  %p331_p0 = scmp.lt.u32.totalorder %s327_s19, %s470_s5 }
 0x228   :  { %p333_p1 = pnand %p331_p0, %p328_p13 }
 0x22a   :  { %336 = shalt.err (!%p333_p1)
}
 0x22b   :  { %s350_s24 = smov 128   ;;  %s351_s25 = smov 8   ;;  %vm220_vm8 = vcmask 7168  }
 0x22c   :  { %236 = dma.vmem_to_hbm [thread:$0]  %s231_s15, 256, %s470_s5, [#allocation4], %s350_s24, %s350_s24, %s351_s25  }
 0x244   :  { %v132_v57 = vpop.xlane.xlu0 %131 }
 0x245   :  { %285 = vlog2.f32 %v132_v57 }
 0x24f   :  { %v286_v61 = vpop.eup %285 }
 0x250   :  { %v136_v1 = vmul.f32 0.6931472, %v286_v61 }
 0x252   :  { %v129_v60 = vpop.xlane.xlu1 %128  ;;  %v138_v7 = vadd.f32 %v136_v1, %v429_v28 }
 0x256   :  { %v153_v6 = vpop.xlane.xlu1 %152 }
 0x291   :  { %v182_v58 = vpop.xlane.xlu0 %181 }
 0x295   :  { %v185_v59 = vpop.xlane.xlu0 %184 }
 0x296   :  { %287 = vlog2.f32 %v185_v59 }
 0x297   :  { %289 = vlog2.f32 %v129_v60 }
 0x298   :  { %291 = vlog2.f32 %v182_v58 }
 0x2a0   :  { %v288_v62 = vpop.eup %287 }
 0x2a1   :  { %v290_v63 = vpop.eup %289  ;;  %v189_v2 = vmul.f32 0.6931472, %v288_v62 }
 0x2a2   :  { %v292_v0 = vpop.eup %291  ;;  %v134_v4 = vmul.f32 0.6931472, %v290_v63 }
 0x2a3   :  { %v187_v5 = vmul.f32 0.6931472, %v292_v0  ;;  %v191_v8 = vadd.f32 %v189_v2, %v419_v21 }
 0x2a4   :  { %v137_v9 = vadd.f32 %v134_v4, %v426_v27 }
 0x2a5   :  { %v190_v13 = vadd.f32 %v187_v5, %v416_v18 }
 0x2a6   :  { %v157_v16 = vsub.f32 %v137_v9, %v153_v6 }
 0x2a8   :  { %v156_v3 = vpop.xlane.xlu0 %155 }
 0x2a9   :  { %v158_v11 = vsub.f32 %v138_v7, %v156_v3 }
 0x2ad   :  { %v215_v10 = vpop.xlane.xlu0 %214 }
 0x2ae   :  { %v217_v12 = vsub.f32 %v191_v8, %v215_v10 }
 0x2b0   :  { %v219_v14 = vadd.f32 %v217_v12, %v158_v11  ;;  %v212_v15 = vpop.xlane.xlu1 %211 }
 0x2b1   :  { %v216_v17 = vsub.f32 %v190_v13, %v212_v15 }
 0x2b2   :  { %222 = vst.msk [vmem:[%s469_s4 + $0x8] sm:$0xff] %vm220_vm8, %v219_v14 }
 0x2b3   :  { %v218_v19 = vadd.f32 %v216_v17, %v157_v16 }
 0x2b5   :  { %221 = vst.msk [vmem:[%s469_s4] sm:$0xff] %vm220_vm8, %v218_v19 }
 0x2b6   :  { %339 = dma.done.wait [#allocation4], 256  }
 0x2b7   :  { %340 = vsyncadd [#allocation4], 4294967040 }
 0x2b8   :  { %242 = vsyncpa [#allocation3], 1 }
 0x2b9   :  { %243 = vsyncpa [#allocation4], 1 }

</bundles_post_ra>
